<compile_context>
chip_gen: v7x
topology: tpu7x:2x2x1
jax: 0.10.0
libtpu: 0.0.40
codegen_flags: <defaults>
</compile_context>

<pallas_src>
import math

import jax
import jax.numpy as jnp
from jax.experimental import pallas as pl
from jax.experimental.pallas import tpu as pltpu


def _round_up(x, m):
    return (x + m - 1) // m * m


def _vmem_budget_bytes():
    """Generation-aware VMEM budget: ~85% of physical VMEM (128 MiB on v5e/v6e,
    64 MiB on v7x), falling back to the v7x size if the query is unavailable."""
    try:
        cap = int(pltpu.get_tpu_info().vmem_capacity_bytes)
    except Exception:
        cap = 64 << 20  # v7x physical VMEM; a safe lower bound on all gens
    return int(cap * 0.85)


def _largest_tile(dim, target, unit=128):
    """Largest multiple of `unit` that divides `dim` and is <= target.
    Falls back to `dim` itself (full-extent block) when none exists."""
    if dim <= unit:
        return dim
    t = min(_round_up(target, unit), (dim // unit) * unit)
    while t >= unit:
        if dim % t == 0:
            return t
        t -= unit
    return dim


# ---------------------------------------------------------------------------
# Kernels
# ---------------------------------------------------------------------------
def _residual_resident_kernel(x_ref, w_ref, b_ref, o_ref):
    """o = x + (x @ W + b), per row-tile, with the full (H, H) weight resident.

    Matmul operands use w_ref's dtype (f32 or bf16); accumulation and the
    bias/residual epilogue stay in f32 (v5e VPU has no bf16 path)."""
    x = x_ref[...]                                        # (tm, H), input dtype
    y = jnp.dot(x.astype(w_ref.dtype), w_ref[...],        # MXU, f32 accumulate
                preferred_element_type=jnp.float32)
    y = y + b_ref[...].astype(jnp.float32)                # bias broadcast, f32
    o_ref[...] = (x.astype(jnp.float32) + y).astype(o_ref.dtype)


def _residual_tiled_kernel(xk_ref, w_ref, xr_ref, b_ref, o_ref, acc_ref):
    """N/K-tiled variant for large H: accumulate over K in an f32 scratch,
    do bias + residual + store at the last K step."""
    k = pl.program_id(2)

    @pl.when(k == 0)
    def _():
        acc_ref[...] = jnp.zeros_like(acc_ref)

    acc_ref[...] += jnp.dot(xk_ref[...].astype(w_ref.dtype), w_ref[...],
                            preferred_element_type=jnp.float32)

    @pl.when(k == pl.num_programs(2) - 1)
    def _():
        y = acc_ref[...] + b_ref[...].astype(jnp.float32)
        o_ref[...] = (xr_ref[...].astype(jnp.float32) + y).astype(o_ref.dtype)


# ---------------------------------------------------------------------------
# Wrapper
# ---------------------------------------------------------------------------
def prepare_residual_linear_params(w, b, matmul_dtype=jnp.bfloat16):
    """One-time weight/bias prep (cast + reshape), hoisted out of the per-call
    path so repeated forwards don't re-stream H^2 weight elements through HBM.

    # TODO(synk): optional int8 weight path (per-channel scale folded into the
    # f32 epilogue) for v5e/v6e; v7x MXU has no int path (fp8 only).
    """
    return w.astype(matmul_dtype), b.reshape(1, -1).astype(jnp.float32)


def residual_linear(x, w_mm, b2, *, tm=512, tn=None, tk=None, force_tiled=False):
    """x: [B, S, H]; w_mm: [H, H] (already in the MXU-operand dtype);
    b2: [1, H] f32.  Returns x + (x @ w_mm + b2)."""
    B, S, H = x.shape
    M = B * S
    x_itm = jnp.dtype(x.dtype).itemsize
    w_itm = jnp.dtype(w_mm.dtype).itemsize
    budget = _vmem_budget_bytes()

    # --- row tile --------------------------------------------------------
    M8 = _round_up(M, 8)
    if M8 <= tm:
        # Split so the grid has >= 2 steps: lets "parallel" shard row tiles
        # across both v7x TensorCores even for decode-sized M.
        tm_base = max(8, _round_up((M8 + 1) // 2, 8))
    else:
        tm_base = _round_up(tm, 8)

    def resident_vmem(t):
        return (2 * t * H * x_itm        # x tile, double-buffered
                + 2 * t * H * x_itm      # out tile, double-buffered
                + H * H * w_itm          # weight, single-buffered (Buffered(1))
                + 8 * H * 4)             # bias, single-buffered (8-sublane pad)

    tm_res = tm_base
    while tm_res > 128 and resident_vmem(tm_res) > budget:
        tm_res = max(128, _round_up(tm_res // 2, 8))

    use_tiled = force_tiled or resident_vmem(tm_res) > budget

    # Pad only to the 8-row sublane unit (usually a no-op); ragged last row
    # tiles are masked by Pallas, so there is no pad/slice to a multiple of tm.
    x2 = x.reshape(M, H)
    if M8 != M:
        x2 = jnp.pad(x2, ((0, M8 - M), (0, 0)))
    Mp = M8

    if not use_tiled:
        # ---------------- resident-weight, row-tiled path -----------------
        tm_eff = tm_res
        grid_m = pl.cdiv(Mp, tm_eff)
        est = resident_vmem(tm_eff)
        vmem_limit = int(min(budget, max(est + (4 << 20), 32 << 20)))

        cost = pl.CostEstimate(
            flops=2 * Mp * H * H,
            transcendentals=0,
            bytes_accessed=int(2 * Mp * H * x_itm + H * H * w_itm + H * 4),
        )

        extra = {}
        if Mp == M:
            # Each x tile is fully consumed before its output tile is written
            # and never re-read -> safe to reuse the input buffer.
            extra["input_output_aliases"] = {0: 0}

        out = pl.pallas_call(
            _residual_resident_kernel,
            out_shape=jax.ShapeDtypeStruct((Mp, H), x.dtype),
            grid_spec=pltpu.PrefetchScalarGridSpec(
                num_scalar_prefetch=0,
                grid=(grid_m,),
                in_specs=[
                    pl.BlockSpec((tm_eff, H), lambda i: (i, 0)),        # x rows
                    pl.BlockSpec((H, H), lambda i: (0, 0),              # weight
                                 pipeline_mode=pl.Buffered(1)),
                    pl.BlockSpec((1, H), lambda i: (0, 0),              # bias
                                 pipeline_mode=pl.Buffered(1)),
                ],
                out_specs=pl.BlockSpec((tm_eff, H), lambda i: (i, 0)),
            ),
            compiler_params=pltpu.CompilerParams(
                dimension_semantics=("parallel",),
                vmem_limit_bytes=vmem_limit,
            ),
            cost_estimate=cost,
            **extra,
        )(x2, w_mm, b2)
    else:
        # ---------------- N/K-tiled path (large H / forced) ----------------
        tn_eff = tn if tn is not None else _largest_tile(H, 256)
        tk_eff = tk if tk is not None else _largest_tile(H, 512)
        assert H % tn_eff == 0 and H % tk_eff == 0, "tn/tk must divide H"

        def tiled_vmem(t):
            return (2 * t * tk_eff * x_itm       # x K-slice (matmul operand)
                    + 2 * tk_eff * tn_eff * w_itm
                    + 2 * t * tn_eff * x_itm     # x N-slice (residual)
                    + 2 * 8 * tn_eff * 4         # bias
                    + 2 * t * tn_eff * x_itm     # out tile
                    + t * tn_eff * 4)            # f32 accumulator scratch

        tm_eff = tm_base
        while tm_eff > 128 and tiled_vmem(tm_eff) > budget:
            tm_eff = max(128, _round_up(tm_eff // 2, 8))

        grid_m = pl.cdiv(Mp, tm_eff)
        gj = H // tn_eff
        gk = H // tk_eff
        est = tiled_vmem(tm_eff)
        vmem_limit = int(min(budget, max(est + (4 << 20), 32 << 20)))

        cost = pl.CostEstimate(
            flops=2 * Mp * H * H,
            transcendentals=0,
            bytes_accessed=int(Mp * H * x_itm * (gj + 1)
                               + H * H * w_itm * grid_m
                               + H * 4
                               + Mp * H * x_itm),
        )

        out = pl.pallas_call(
            _residual_tiled_kernel,
            out_shape=jax.ShapeDtypeStruct((Mp, H), x.dtype),
            grid_spec=pltpu.PrefetchScalarGridSpec(
                num_scalar_prefetch=0,
                grid=(grid_m, gj, gk),
                in_specs=[
                    pl.BlockSpec((tm_eff, tk_eff), lambda i, j, k: (i, k)),  # x K-slice
                    pl.BlockSpec((tk_eff, tn_eff), lambda i, j, k: (k, j)),  # weight tile
                    pl.BlockSpec((tm_eff, tn_eff), lambda i, j, k: (i, j)),  # x N-slice
                    pl.BlockSpec((1, tn_eff), lambda i, j, k: (0, j)),       # bias tile
                ],
                out_specs=pl.BlockSpec((tm_eff, tn_eff), lambda i, j, k: (i, j)),
                scratch_shapes=[pltpu.VMEM((tm_eff, tn_eff), jnp.float32)],
            ),
            compiler_params=pltpu.CompilerParams(
                dimension_semantics=("parallel", "parallel", "arbitrary"),
                vmem_limit_bytes=vmem_limit,
            ),
            cost_estimate=cost,
        )(x2, w_mm, x2, b2)

    if Mp != M:
        out = out[:M]
    return out.reshape(B, S, H)


if __name__ == "__main__":
    key = jax.random.PRNGKey(0)
    kx, kw, kb = jax.random.split(key, 3)

    # Small shapes consistent with the module: x is [B, S, H].
    B, S, H = 2, 8, 128
    x = jax.random.normal(kx, (B, S, H), dtype=jnp.float32)
    # Deterministic nn.Linear-style init: U(-1/sqrt(H), 1/sqrt(H)).
    bound = 1.0 / math.sqrt(H)
    w = jax.random.uniform(kw, (H, H), minval=-bound, maxval=bound,
                           dtype=jnp.float32)
    b = jax.random.uniform(kb, (H,), minval=-bound, maxval=bound,
                           dtype=jnp.float32)

    # Pure-JAX reference of the residual semantics: x + fn(x).
    ref = x + (jnp.einsum("bsh,hk->bsk", x, w) + b)

    # 1) f32 resident-weight path: bit-tight check.
    w32, b32 = prepare_residual_linear_params(w, b, jnp.float32)
    out_f32 = jax.block_until_ready(residual_linear(x, w32, b32))
    assert jnp.allclose(out_f32, ref, atol=1e-5, rtol=1e-5)

    # 2) bf16 MXU-operand path (v6e/v7x fast path): loosened tolerance.
    wbf, bbf = prepare_residual_linear_params(w, b, jnp.bfloat16)
    out_bf16 = jax.block_until_ready(residual_linear(x, wbf, bbf))
    assert jnp.allclose(out_bf16, ref, atol=3e-2, rtol=3e-2)

    # 3) N/K-tiled large-H fallback, forced at a small shape so the K
    #    accumulation loop (gk > 1) and the N loop (gj > 1) are exercised.
    H2 = 256
    x_t = jax.random.normal(kx, (B, S, H2), dtype=jnp.float32)
    bound2 = 1.0 / math.sqrt(H2)
    w_t = jax.random.uniform(kw, (H2, H2), minval=-bound2, maxval=bound2,
                             dtype=jnp.float32)
    b_t = jax.random.uniform(kb, (H2,), minval=-bound2, maxval=bound2,
                             dtype=jnp.float32)
    ref_t = x_t + (jnp.einsum("bsh,hk->bsk", x_t, w_t) + b_t)
    w_tp, b_tp = prepare_residual_linear_params(w_t, b_t, jnp.float32)
    out_t = jax.block_until_ready(
        residual_linear(x_t, w_tp, b_tp, force_tiled=True, tn=128, tk=128))
    assert jnp.allclose(out_t, ref_t, atol=1e-5, rtol=1e-5)

    print("KERNEL_OK")
</pallas_src>

<mosaic_0001>
module attributes {stable_mosaic.version = 11 : i64} {
  func.func @_residual_resident_kernel(%arg0: i32, %arg1: memref<8x128xf32, #tpu.memory_space<vmem>>, %arg2: memref<128x128xf32, #tpu.memory_space<vmem>>, %arg3: memref<1x128xf32, #tpu.memory_space<vmem>>, %arg4: memref<8x128xf32, #tpu.memory_space<vmem>>) attributes {dimension_semantics = [#tpu.dimension_semantics<parallel>], iteration_bounds = array<i64: 2>, scalar_prefetch = 0 : i64, scratch_operands = 0 : i64, tpu.core_type = #tpu.core_type<tc>, window_params = [{transform_indices = @transform_0, window_bounds = array<i64: 8, 128>}, {pipeline_mode = #tpu.pipeline_mode<synchronous>, transform_indices = @transform_1, window_bounds = array<i64: 128, 128>}, {pipeline_mode = #tpu.pipeline_mode<synchronous>, transform_indices = @transform_2, window_bounds = array<i64: 1, 128>}, {transform_indices = @transform_3, window_bounds = array<i64: 8, 128>}]} {
    %c0 = arith.constant 0 : index
    %c0_0 = arith.constant 0 : index
    %0 = vector.load %arg1[%c0, %c0_0] : memref<8x128xf32, #tpu.memory_space<vmem>>, vector<8x128xf32>
    %c0_1 = arith.constant 0 : index
    %c0_2 = arith.constant 0 : index
    %1 = vector.load %arg2[%c0_1, %c0_2] : memref<128x128xf32, #tpu.memory_space<vmem>>, vector<128x128xf32>
    %cst = arith.constant dense<0.000000e+00> : vector<8x128xf32>
    %2 = tpu.matmul %0, %1, %cst {dimension_numbers = #tpu.dot_dimension_numbers<[1], [0], [0], [1], [0, 0, 1, 1], [], []>} : vector<8x128xf32>, vector<128x128xf32>, vector<8x128xf32> -> vector<8x128xf32>
    %c0_3 = arith.constant 0 : index
    %c0_4 = arith.constant 0 : index
    %3 = vector.load %arg3[%c0_3, %c0_4] : memref<1x128xf32, #tpu.memory_space<vmem>>, vector<1x128xf32>
    %4 = vector.broadcast %3 : vector<1x128xf32> to vector<8x128xf32>
    %5 = arith.addf %2, %4 : vector<8x128xf32>
    %6 = arith.addf %0, %5 : vector<8x128xf32>
    %c0_5 = arith.constant 0 : index
    %c0_6 = arith.constant 0 : index
    %7 = vector.load %arg4[%c0_5, %c0_6] : memref<8x128xf32, #tpu.memory_space<vmem>>, vector<8x128xf32>
    tpu.vector_store %arg4[%c0_5, %c0_6], %6 {strides = array<i32>} : memref<8x128xf32, #tpu.memory_space<vmem>>, vector<8x128xf32>,
    return
  }
  func.func @transform_0(%arg0: i32) -> (i32, i32) {
    %c0_i32 = arith.constant 0 : i32
    %c0_i32_0 = arith.constant 0 : i32
    return %arg0, %c0_i32 : i32, i32
  }
  func.func @transform_1(%arg0: i32) -> (i32, i32) {
    %c0_i32 = arith.constant 0 : i32
    %c0_i32_0 = arith.constant 0 : i32
    %c0_i32_1 = arith.constant 0 : i32
    return %c0_i32, %c0_i32_0 : i32, i32
  }
  func.func @transform_2(%arg0: i32) -> (i32, i32) {
    %c0_i32 = arith.constant 0 : i32
    %c0_i32_0 = arith.constant 0 : i32
    %c0_i32_1 = arith.constant 0 : i32
    return %c0_i32, %c0_i32_0 : i32, i32
  }
  func.func @transform_3(%arg0: i32) -> (i32, i32) {
    %c0_i32 = arith.constant 0 : i32
    %c0_i32_0 = arith.constant 0 : i32
    return %arg0, %c0_i32 : i32, i32
  }
}

</mosaic_0001>

<bundles_post_ra>
// kernel: tpu_custom_call.1
= control target key start
LH: loop header
LB: loop body
LE: loop exit
PB: predicated region body
PF: predicated region fallthrough
CT: control target
= control target key end

     0   :  { %8 = vsyncpa [#allocation3], 0  ;;  %s908_s0 = inlined_call_operand.hbm [shape: f32[16,128], index: 0, kind: input, shape index: {}, may-alias: {0,3}]   ;;  %s909_s1 = inlined_call_operand.hbm [shape: f32[128,128], index: 1, kind: input, shape index: {}]   ;;  %s910_s2 = inlined_call_operand.vmem [shape: f32[1,128], index: 2, kind: input, shape index: {}]   ;;  %s911_s3 = inlined_call_operand.hbm [shape: f32[16,128], index: 3, kind: output, shape index: {}, may-alias: {0,3}]  }
   0x1   :  { %10 = vsyncpa [#allocation3 + $0x1], 0 }
   0x2   :  { %11 = vsyncpa [#allocation6], 0 }
   0x3   :  { %12 = vsyncpa [#allocation4], 0 }
   0x4   :  { %14 = vsyncpa [#allocation4 + $0x1], 0  ;;  %s702_s12 = smov 0   ;;  %s704_s13 = smov 0  }
   0x5   :  { %s706_s14 = smov 0   ;;  %s708_s15 = smov 0  }
   0x6 LB: > { %s723_s16 = sadd.s32 4294967295, %s672_s15   ;;  %s391_s17 = sadd.s32 4294967294, %s672_s15   ;;  %s672_s15 = sphi %s708_s15, %s931_s15   ;;  %s668_s14 = sphi %s706_s14, %s930_s14   ;;  %s664_s13 = sphi %s704_s13, %s929_s13   ;;  %s660_s12 = sphi %s702_s12, %s928_s12  }
   0x7   : > { %p40_p0 = scmp.ne.s32.totalorder %s664_s13, %s660_s12  ;;  %p912_p1 = scmp.eq.s32.totalorder %s723_s16, 0 }
   0x8   : > { %p112_p3 = scmp.eq.s32.totalorder %s391_s17, 1  ;;  %p392_p5 = scmp.ge.s32.totalorder %s672_s15, 1 }
   0x9   : > { %p732_p4 = por %p912_p1, %p40_p0  ;;  %p119_p7 = scmp.lt.s32.totalorder %s672_s15, 3 }
   0xa   : > { %p737_p6 = por %p112_p3, %p40_p0  ;;  %s674_s21 = smov [#allocation5]  }
   0xb   : > { %s915_s18 = scalar_select %p732_p4, 1, 0 }
   0xc   : > { %s916_s19 = scalar_select %p737_p6, 1, 0 }
   0xd   : > { %p742_p8 = pnand %p392_p5, %p119_p7  ;;  %s131_s22 = sshll.u32 %s674_s21, 4  ;;  %s746_s22 = int_to_ptr.vmem [resolvable:$true] %s131_s22 }
   0xe   : > { %s758_s24 = sadd.s32 1, %s672_s15   ;;  %s27_s25 = sadd.s32 1, %s668_s14 }
   0xf   : > { %s917_s20 = scalar_select %p742_p8, 1, 0 }
  0x10   : > { %p490_p9 = pneg %p742_p8  ;;  %s24_s26 = ssub.s32 %s672_s15, %s758_s24 }
  0x11   : > { %s544_s29 = scalar_lea.hbm %s909_s1, 2048 }
  0x12   : > { %p753_p11 = pnand %p490_p9, %p912_p1  ;;  %p545_p12 = scmp.ne.s32.totalorder %s909_s1, %s544_s29 }
  0x13   : > { %p551_p5 = scmp.lt.u32.totalorder %s544_s29, %s909_s1 }
  0x14   : > { %p546_p13 = pneg %p753_p11 }
  0x16   : > { %p547_p0 = pnand %p546_p13, %p545_p12 }
  0x18   : > { %p548_p3 = pneg %p547_p0 }
  0x1a   : > { %p553_p7 = pnand %p551_p5, %p548_p3 }
  0x1c   : > { %556 = shalt.err (!%p553_p7)
}
  0x1d   : > { %s557_s7 = scalar_lea.vmem %s746_s22, 2048  ;;  %p565_p2 = scmp.lt.s32.totalorder %s746_s22, %s746_s22 }
  0x1e   : > { %p558_p9 = scmp.ne.s32.totalorder %s746_s22, %s557_s7  ;;  %p566_p6 = scmp.lt.s32.totalorder %s557_s7, %s557_s7 }
  0x20   : > { %p560_p10 = pnand %p558_p9, %p546_p13  ;;  %p567_p4 = por %p566_p6, %p565_p2 }
  0x22   : > { %p561_p1 = pneg %p560_p10 }
  0x24   : > { %p568_p8 = pnand %p567_p4, %p561_p1 }
  0x26   : > { %571 = shalt.err (!%p568_p8)
}
  0x27   : > { %s675_s8 = smov 128   ;;  %s676_s9 = smov 8  }
  0x28   : > { %493 = dma.hbm_to_vmem [thread:$0]  (!%p753_p11), %s909_s1, 2048, %s746_s22, [#allocation6], %s675_s8, %s675_s8, %s676_s9  }
  0x29   : > { %p25_p2 = scmp.eq.s32.totalorder %s24_s26, 0  ;;  %p34_p1 = scmp.ne.s32.totalorder %s668_s14, %s664_s13 }
  0x2a   : > { %p35_p4 = scmp.eq.s32.totalorder %s672_s15, 0  ;;  %p503_p6 = scmp.lt.s32.totalorder %s672_s15, 2 }
  0x2b   : > { %s789_s17 = scalar_select %p25_p2, %s668_s14, %s27_s25  }
  0x2c   : > { %p36_p8 = por %p35_p4, %p34_p1  ;;  %p919_p10 = scmp.eq.s32.totalorder %s723_s16, 1 }
  0x2d   : > { %s148_s27 = sand.u32 1, %s668_s14   ;;  %s396_s28 = sshll.u32 %s672_s15, 7 }
  0x2e   : > { %p793_p12 = por %p919_p10, %p34_p1  ;;  %s395_s29 = sshll.u32 %s148_s27, 3 }
  0x2f   : > { %s802_s4 = scalar_lea.hbm %s908_s0, %s396_s28  ;;  %s152_s22 = scalar_lea.vmem [#allocation2], %s395_s29 }
  0x30   : > { %s159_s25 = sshll.u32 %s152_s22, 4  ;;  %p804_p11 = pnand %p503_p6, %p36_p8  ;;  %s808_s25 = int_to_ptr.vmem [resolvable:$true] %s159_s25 }
  0x31   : > { %s149_s5 = scalar_lea.sflag [#allocation3], %s148_s27  ;;  %s572_s6 = scalar_lea.hbm %s802_s4, 128 }
  0x32   : > { %p573_p13 = scmp.ne.s32.totalorder %s802_s4, %s572_s6  ;;  %p574_p0 = pneg %p804_p11 }
  0x33   : > { %s577_s9 = scalar_lea.hbm %s908_s0, 256  ;;  %p578_p7 = scmp.lt.u32.totalorder %s802_s4, %s908_s0 }
  0x34   : > { %p575_p3 = pnand %p574_p0, %p573_p13  ;;  %p579_p9 = scmp.lt.u32.totalorder %s577_s9, %s572_s6 }
  0x35   : > { %p581_p1 = scmp.lt.u32.totalorder %s572_s6, %s802_s4 }
  0x36   : > { %p576_p5 = pneg %p575_p3  ;;  %p580_p2 = por %p579_p9, %p578_p7 }
  0x38   : > { %p582_p4 = por %p581_p1, %p580_p2 }
  0x3a   : > { %p583_p6 = pnand %p582_p4, %p576_p5 }
  0x3c   : > { %586 = shalt.err (!%p583_p6)
}
  0x3d   : > { %s587_s27 = scalar_lea.vmem %s808_s25, 128  ;;  %s677_s28 = smov [#allocation2]  }
  0x3e   : > { %p588_p8 = scmp.ne.s32.totalorder %s808_s25, %s587_s27  ;;  %s592_s29 = sshll.u32 %s677_s28, 4  ;;  %s593_s29 = int_to_ptr.vmem [resolvable:$false] %s592_s29 }
  0x3f   : > { %s594_s23 = scalar_lea.vmem %s593_s29, 256  ;;  %p595_p3 = scmp.lt.s32.totalorder %s808_s25, %s593_s29 }
  0x40   : > { %p590_p10 = pnand %p588_p8, %p574_p0  ;;  %p596_p7 = scmp.lt.s32.totalorder %s594_s23, %s587_s27 }
  0x42   : > { %p591_p13 = pneg %p590_p10  ;;  %p597_p9 = por %p596_p7, %p595_p3 }
  0x44   : > { %p598_p2 = pnand %p597_p9, %p591_p13 }
  0x46   : > { %601 = shalt.err (!%p598_p2)
}
  0x47   : > { %497 = dma.hbm_to_vmem [thread:$0]  (!%p804_p11), %s802_s4, 128, %s808_s25, %s149_s5  }
  0x48   : > { %p922_p5 = scmp.ne.s32.totalorder %s917_s20, 0 }
  0x49   : > { %s838_s30 = sand.u32 (!%p922_p5), 1, %s664_s13   ;;  %p923_p0 = scmp.ne.s32.totalorder (!%p922_p5), %s915_s18, 0 }
  0x4a   : > { %168 = sbr.rel (%p922_p5) target bundleno = 349 (0x15d), region = 32  ;;  %s398_s22 = sshll.u32 (!%p922_p5), %s838_s30, 3 }
  0x4b   : > { %s171_s6 = scalar_lea.sflag (!%p922_p5), [#allocation3], %s838_s30  ;;  %s844_s7 = scalar_lea.vmem (!%p922_p5), [#allocation2], %s398_s22 }
  0x51   : > { %647 = dma.done.wait (%p923_p0), %s171_s6, 128  }
  0x52   : > { %649 = vsyncadd (%p923_p0), %s171_s6, 4294967168  ;;  %p924_p11 = scmp.eq.s32.totalorder %s723_s16, 0 }
  0x54   : > { %651 = dma.done.wait (%p924_p11), [#allocation6], 2048   ;;  %p925_p1 = pmov %p924_p11 }
  0x55   : > { %v678_v0 = vmov 0.0|0.0   ;;  %vm679_vm0 = vmmov 0   ;;  %v680_v1 = vmov 0.0   ;;  %v202_v2 = vld [vmem:[#allocation5] sm:$0xff]  ;;  %v203_v3 = vld [vmem:[#allocation5 + $0x8] sm:$0xff]  ;;  %v204_v4 = vld [vmem:[#allocation5 + $0x10] sm:$0xff] }
  0x56   : > { %653 = vsyncadd (%p925_p1), [#allocation6], 4294965248  ;;  %458 = vmatprep.subr.bf16.mxu0 %v678_v0  ;;  %455 = vmatprep.mubr.msk.f32.mxu0 %vm679_vm0, %v680_v1  ;;  %v459_v5 = vpack.c.bf16 %v203_v3, %v202_v2  ;;  %v205_v6 = vld [vmem:[#allocation5 + $0x18] sm:$0xff]  ;;  %v206_v8 = vld [vmem:[#allocation5 + $0x20] sm:$0xff]  ;;  %s403_s4 = sshll.u32 %s723_s16, 7  ;;  %s200_s25 = scalar_lea.vmem [#allocation7], %s398_s22 }
  0x57   : > { %v462_v7 = vpack.c.bf16 %v205_v6, %v204_v4  ;;  %v207_v9 = vld [vmem:[#allocation5 + $0x28] sm:$0xff]  ;;  %v208_v11 = vld [vmem:[#allocation5 + $0x30] sm:$0xff]  ;;  %v209_v12 = vld [vmem:[#allocation5 + $0x38] sm:$0xff]  ;;  %s311_s26 = sshll.u32 %s200_s25, 4  ;;  %s864_s9 = scalar_lea.hbm %s911_s3, %s403_s4  ;;  %s866_s26 = int_to_ptr.vmem [resolvable:$true] %s311_s26 }
  0x58   : > { %460 = vmatpush3.bf16.msra.mxu0 %v459_v5  ;;  %v465_v10 = vpack.c.bf16 %v207_v9, %v206_v8  ;;  %v468_v13 = vpack.c.bf16 %v209_v12, %v208_v11  ;;  %v210_v14 = vld [vmem:[#allocation5 + $0x40] sm:$0xff]  ;;  %v211_v15 = vld [vmem:[#allocation5 + $0x48] sm:$0xff]  ;;  %v212_v17 = vld [vmem:[#allocation5 + $0x50] sm:$0xff]  ;;  %s298_s10 = scalar_lea.sflag [#allocation4], %s838_s30  ;;  %s602_s11 = scalar_lea.vmem %s866_s26, 128 }
  0x59   : > { %461 = vmatprep.subr.bf16.mxu0 %v678_v0  ;;  %v471_v16 = vpack.c.bf16 %v211_v15, %v210_v14  ;;  %v213_v18 = vld [vmem:[#allocation5 + $0x58] sm:$0xff]  ;;  %v214_v20 = vld [vmem:[#allocation5 + $0x60] sm:$0xff]  ;;  %v215_v21 = vld [vmem:[#allocation5 + $0x68] sm:$0xff]  ;;  %p603_p4 = scmp.ne.s32.totalorder %s866_s26, %s602_s11  ;;  %s681_s16 = smov [#allocation7]  }
  0x5a   : > { %v474_v19 = vpack.c.bf16 %v213_v18, %v212_v17  ;;  %v477_v22 = vpack.c.bf16 %v215_v21, %v214_v20  ;;  %v216_v23 = vld [vmem:[#allocation5 + $0x70] sm:$0xff]  ;;  %v217_v24 = vld [vmem:[#allocation5 + $0x78] sm:$0xff]  ;;  %s606_s27 = sshll.u32 %s681_s16, 4  ;;  %s607_s27 = int_to_ptr.vmem [resolvable:$false] %s606_s27 }
  0x5b   : > { %v480_v25 = vpack.c.bf16 %v217_v24, %v216_v23  ;;  %v201_v26 = vld [vmem:[%s844_s7] sm:$0xff]  ;;  %p604_p6 = pnand %p603_p4, %p793_p12  ;;  %s608_s28 = scalar_lea.vmem %s607_s27, 256 }
  0x5c   : > { %463 = vmatpush3.bf16.msra.mxu0 %v462_v7  ;;  %v401_v27 = vld [vmem:[%s910_s2] ss:$0 sm:$0xff]  ;;  %p609_p10 = scmp.lt.s32.totalorder %s866_s26, %s607_s27  ;;  %p610_p13 = scmp.lt.s32.totalorder %s608_s28, %s602_s11 }
  0x5d   : > { %464 = vmatprep.subr.bf16.mxu0 %v678_v0  ;;  %p605_p8 = pneg %p604_p6 }
  0x5e   : > { %p611_p3 = por %p610_p13, %p609_p10 }
  0x60   : > { %466 = vmatpush3.bf16.msra.mxu0 %v465_v10  ;;  %p612_p7 = pnand %p611_p3, %p605_p8 }
  0x61   : > { %467 = vmatprep.subr.bf16.mxu0 %v678_v0 }
  0x64   : > { %469 = vmatpush3.bf16.msra.mxu0 %v468_v13 }
  0x65   : > { %470 = vmatprep.subr.bf16.mxu0 %v678_v0 }
  0x68   : > { %472 = vmatpush3.bf16.msra.mxu0 %v471_v16 }
  0x69   : > { %473 = vmatprep.subr.bf16.mxu0 %v678_v0 }
  0x6c   : > { %475 = vmatpush3.bf16.msra.mxu0 %v474_v19 }
  0x6d   : > { %476 = vmatprep.subr.bf16.mxu0 %v678_v0 }
  0x70   : > { %478 = vmatpush3.bf16.msra.mxu0 %v477_v22 }
  0x71   : > { %479 = vmatprep.subr.bf16.mxu0 %v678_v0 }
  0x74   : > { %481 = vmatpush3.bf16.msra.mxu0 %v480_v25 }
  0x77   : > { %456 = vmatmul.mubr.f32.vlgmr.msra.gmra.mrb[0].mxu0 %v201_v26 }
 0x14a   : > { %v291_v28 = vpop.f32.mrb[0].mxu0 }
 0x14b   : > { %v292_v29 = vadd.f32 %v401_v27, %v291_v28  ;;  %v457_v30 = vpop.f32.mrb[1].mxu0 }
 0x14d   : > { %v295_v31 = vadd.f32 %v292_v29, %v201_v26 }
 0x14f   : > { %296 = vst [vmem:[%s200_s25] sm:$0xff] %v295_v31 }
 0x150   : > { %615 = shalt.err (!%p612_p7)
}
 0x151   : > { %s616_s29 = scalar_lea.hbm %s864_s9, 128  ;;  %s620_s22 = scalar_lea.hbm %s911_s3, 256 }
 0x152   : > { %p617_p9 = scmp.ne.s32.totalorder %s864_s9, %s616_s29  ;;  %p621_p0 = scmp.lt.u32.totalorder %s864_s9, %s911_s3 }
 0x153   : > { %p622_p11 = scmp.lt.u32.totalorder %s620_s22, %s616_s29  ;;  %p624_p4 = scmp.lt.u32.totalorder %s616_s29, %s864_s9 }
 0x154   : > { %p618_p2 = pnand %p617_p9, %p793_p12 }
 0x155   : > { %p623_p1 = por %p622_p11, %p621_p0 }
 0x156   : > { %p619_p5 = pneg %p618_p2 }
 0x157   : > { %p625_p6 = por %p624_p4, %p623_p1 }
 0x159   : > { %p626_p8 = pnand %p625_p6, %p619_p5 }
 0x15b   : > { %629 = shalt.err (!%p626_p8)
}
 0x15c   : > { %488 = dma.vmem_to_hbm [thread:$0]  (%p793_p12), %s866_s26, 128, %s864_s9, %s298_s10  }
 0x15d PF: > { %s323_s18 = sand.u32 1, %s660_s12   ;;  %p926_p10 = scmp.ne.s32.totalorder %s916_s19, 0 }
 0x15e   : > { %p927_p13 = scmp.ge.s32.totalorder %s672_s15, 2  ;;  %s324_s20 = scalar_lea.sflag [#allocation4], %s323_s18 }
 0x160   : > { %p499_p3 = pnand %p927_p13, %p926_p10 }
 0x162   : > { %655 = dma.done.wait (!%p499_p3), %s324_s20, 128  }
 0x163   : > { %657 = vsyncadd (!%p499_p3), %s324_s20, 4294967168  ;;  %p17_p7 = scmp.ge.s32.totalorder %s758_s24, 4   ;;  %s928_s12 = smov %s664_s13 }
 0x164   : > { %s929_s13 = smov %s668_s14  ;;  %s930_s14 = smov %s789_s17 }
 0x165   : > { %s931_s15 = smov %s758_s24  ;;  %19 = sbr.rel (!%p17_p7) target bundleno = 6 (0x6), region = 81 }
 0x16c   :  { %329 = vsyncpa [#allocation3], 1 }
 0x16d   :  { %331 = vsyncpa [#allocation3 + $0x1], 1 }
 0x16e   :  { %332 = vsyncpa [#allocation6], 1 }
 0x16f   :  { %333 = vsyncpa [#allocation4], 1 }
 0x170   :  { %335 = vsyncpa [#allocation4 + $0x1], 1 }

</bundles_post_ra>
